<compile_context>
chip_gen: v5e
topology: v5e:2x2
jax: 0.10.0
libtpu: 0.0.40
codegen_flags: <defaults>
</compile_context>

<pallas_src>
import functools

import jax
import jax.numpy as jnp
import numpy as np
from jax import lax
from jax.experimental import pallas as pl
from jax.experimental.pallas import tpu as pltpu


# ------------------------------ Fused kernel --------------------------------

def _bottleneck_kernel(x_ref, w1_ref, s1_ref, b1_ref,
                       w2_ref, s2_ref, b2_ref,
                       w3_ref, s3_ref, b3_ref,
                       o_ref, patch_ref, *, H, W):
    """Fused Bottleneck forward for one image.

    Layout (channel-major):
      x_ref   : (Cin, H*W)          input image, lanes = spatial
      w1_ref  : (width, Cin)        1x1 conv weight (PyTorch (Cout, Cin))
      w2_ref  : (width, 9*width)    3x3 conv weight, tap-major im2col layout
      w3_ref  : (out_c, width)      1x1 conv weight
      s*/b*   : (C, 1)              folded BatchNorm scale / bias
      o_ref   : (out_c, H*W)        output, lane-dense
      patch   : (9*width, H*W)      VMEM scratch for the im2col patch matrix
    """
    HW = H * W
    width = w1_ref.shape[0]

    x = x_ref[...]                                           # (Cin, HW)

    # ---- conv1 (1x1) + bn1 + relu ------------------------------------------
    h1 = jnp.dot(w1_ref[...], x, preferred_element_type=jnp.float32)
    h1 = jnp.maximum(h1 * s1_ref[...] + b1_ref[...], 0.0)    # (width, HW)

    # ---- newPad2d(1) (replication) + conv2 (3x3) as one im2col matmul ------
    # Tap (dy, dx) reads input at (clamp(h+dy-1, 0, H-1), clamp(w+dx-1, 0, W-1)).
    # Vertical clamp handled by lane-slice concat; horizontal clamp by a
    # one-lane shift fixed up at row edges with a select.
    w_idx = lax.broadcasted_iota(jnp.int32, (width, HW), 1) % W

    def vshift(v, oy):   # out row h reads in row clamp(h + oy, 0, H-1)
        if oy == 0:
            return v
        if oy == 1:      # rows 0..H-2 <- rows 1..H-1 ; row H-1 <- row H-1
            return jnp.concatenate([v[:, W:], v[:, HW - W:]], axis=1)
        # oy == -1        row 0 <- row 0 ; rows 1..H-1 <- rows 0..H-2
        return jnp.concatenate([v[:, :W], v[:, :HW - W]], axis=1)

    def hshift(v, ox):   # out col w reads in col clamp(w + ox, 0, W-1)
        if ox == 0:
            return v
        if ox == 1:      # dest[m] = v[m+1], except w == W-1 keeps v[m]
            s = jnp.concatenate([v[:, 1:], v[:, :1]], axis=1)
            return jnp.where(w_idx == W - 1, v, s)
        # ox == -1        dest[m] = v[m-1], except w == 0 keeps v[m]
        s = jnp.concatenate([v[:, :1], v[:, :-1]], axis=1)
        return jnp.where(w_idx == 0, v, s)

    for dy in range(3):
        vrow = vshift(h1, dy - 1)
        for dx in range(3):
            t = dy * 3 + dx
            patch_ref[t * width:(t + 1) * width, :] = hshift(vrow, dx - 1)

    # Single matmul, K = 9*width (instead of 9 tiny K=width matmuls).
    h2 = jnp.dot(w2_ref[...], patch_ref[...],
                 preferred_element_type=jnp.float32)          # (width, HW)
    h2 = jnp.maximum(h2 * s2_ref[...] + b2_ref[...], 0.0)

    # ---- conv3 (1x1) + bn3 + residual add + relu ---------------------------
    y = jnp.dot(w3_ref[...], h2, preferred_element_type=jnp.float32)
    y = y * s3_ref[...] + b3_ref[...] + x                     # Cin == out_c
    o_ref[...] = jnp.maximum(y, 0.0)


# ------------------------------- Wrapper -------------------------------------

def bottleneck_forward(x_nchw, p):
    """Forward pass of Bottleneck.  x_nchw: (N, Cin, H, W) float32."""
    N, Cin, H, W = x_nchw.shape
    width = p["w1"].shape[0]
    out_c = p["w3"].shape[0]
    assert Cin == out_c, "identity residual (downsample=None) needs inplanes == planes*4"
    HW = H * W

    # NCHW is already channel-major; this reshape is layout-identical (free).
    x2 = x_nchw.reshape(N, Cin, HW)

    kernel = functools.partial(_bottleneck_kernel, H=H, W=W)
    const2 = lambda n: (0, 0)

    out = pl.pallas_call(
        kernel,
        out_shape=jax.ShapeDtypeStruct((N, out_c, HW), jnp.float32),
        grid_spec=pltpu.PrefetchScalarGridSpec(
            num_scalar_prefetch=0,
            grid=(N,),                                  # one image per grid step
            in_specs=[
                pl.BlockSpec((None, Cin, HW), lambda n: (n, 0, 0)),   # x
                pl.BlockSpec((width, Cin), const2),                   # w1
                pl.BlockSpec((width, 1), const2),                     # s1
                pl.BlockSpec((width, 1), const2),                     # b1
                pl.BlockSpec((width, 9 * width), const2),             # w2 (im2col)
                pl.BlockSpec((width, 1), const2),                     # s2
                pl.BlockSpec((width, 1), const2),                     # b2
                pl.BlockSpec((out_c, width), const2),                 # w3
                pl.BlockSpec((out_c, 1), const2),                     # s3
                pl.BlockSpec((out_c, 1), const2),                     # b3
            ],
            out_specs=pl.BlockSpec((None, out_c, HW), lambda n: (n, 0, 0)),
            scratch_shapes=[
                pltpu.VMEM((9 * width, HW), jnp.float32),             # im2col patch
            ],
        ),
        compiler_params=pltpu.CompilerParams(
            dimension_semantics=("parallel",),          # batch axis across TCs (v7x)
        ),
    )(x2, p["w1"], p["s1"], p["b1"], p["w2"], p["s2"], p["b2"],
      p["w3"], p["s3"], p["b3"])

    return out.reshape(N, out_c, H, W)                  # already NCHW layout


# ------------------------- Deterministic parameters --------------------------

def init_params(key, inplanes, planes, base_width=64, groups=1):
    width = int(planes * (base_width / 64.0)) * groups
    out_c = planes * 4
    eps = 1e-5
    ks = jax.random.split(key, 6)

    def bn_fold(k, c):
        kg, kb, km, kv = jax.random.split(k, 4)
        gamma = 0.5 + jax.random.uniform(kg, (c,), jnp.float32)
        beta = 0.1 * jax.random.normal(kb, (c,), jnp.float32)
        mean = 0.1 * jax.random.normal(km, (c,), jnp.float32)
        var = 0.5 + jax.random.uniform(kv, (c,), jnp.float32)
        scale = gamma / jnp.sqrt(var + eps)
        bias = beta - mean * scale
        return scale.reshape(c, 1), bias.reshape(c, 1)   # (C, 1) for lane broadcast

    # PyTorch conv weights: (Cout, Cin, kh, kw)
    w1_t = 0.1 * jax.random.normal(ks[0], (width, inplanes, 1, 1), jnp.float32)
    w2_t = 0.1 * jax.random.normal(ks[1], (width, width, 3, 3), jnp.float32)
    w3_t = 0.1 * jax.random.normal(ks[2], (out_c, width, 1, 1), jnp.float32)

    p = {}
    p["w1"] = w1_t[:, :, 0, 0]                                        # (width, Cin)
    # (Cout, Cin, 3, 3) -> (Cout, kh, kw, Cin) -> (Cout, 9*Cin); row order
    # matches the kernel's tap-major patch build (t = dy*3 + dx, then channel).
    p["w2"] = jnp.transpose(w2_t, (0, 2, 3, 1)).reshape(width, 9 * width)
    p["w3"] = w3_t[:, :, 0, 0]                                        # (out_c, width)
    p["s1"], p["b1"] = bn_fold(ks[3], width)
    p["s2"], p["b2"] = bn_fold(ks[4], width)
    p["s3"], p["b3"] = bn_fold(ks[5], out_c)
    return p


# ------------------------------- Reference -----------------------------------

def reference(x_nchw, p):
    width = p["w1"].shape[0]
    x = jnp.transpose(x_nchw, (0, 2, 3, 1))                           # NHWC
    y = jnp.einsum("nhwc,dc->nhwd", x, p["w1"]) * p["s1"][:, 0] + p["b1"][:, 0]
    y = jnp.maximum(y, 0.0)
    yp = jnp.pad(y, ((0, 0), (1, 1), (1, 1), (0, 0)), mode="edge")    # newPad2d(1)
    w2_hwio = jnp.transpose(p["w2"].reshape(width, 3, 3, width), (1, 2, 3, 0))
    y2 = lax.conv_general_dilated(yp, w2_hwio, (1, 1), "VALID",
                                  dimension_numbers=("NHWC", "HWIO", "NHWC"))
    y2 = jnp.maximum(y2 * p["s2"][:, 0] + p["b2"][:, 0], 0.0)
    y3 = jnp.einsum("nhwc,dc->nhwd", y2, p["w3"]) * p["s3"][:, 0] + p["b3"][:, 0]
    y3 = jnp.maximum(y3 + x, 0.0)
    return jnp.transpose(y3, (0, 3, 1, 2))


# --------------------------------- Main ---------------------------------------

if __name__ == "__main__":
    # Bottleneck(inplanes=16, planes=4): width=4, output channels=16 (=inplanes,
    # so the identity residual is valid with downsample=None, stride=1).
    N, inplanes, planes, H, W = 2, 16, 4, 16, 16

    key = jax.random.PRNGKey(0)
    k_x, k_p = jax.random.split(key)
    x = jax.random.normal(k_x, (N, inplanes, H, W), jnp.float32)      # NCHW input
    params = init_params(k_p, inplanes, planes)

    out = jax.block_until_ready(bottleneck_forward(x, params))
    ref = jax.block_until_ready(reference(x, params))

    np.testing.assert_allclose(np.asarray(out), np.asarray(ref),
                               rtol=1e-4, atol=1e-4)
    assert out.shape == (N, planes * 4, H, W)
    print("KERNEL_OK")
</pallas_src>

<mosaic_0001>
module attributes {stable_mosaic.version = 11 : i64} {
  func.func @_bottleneck_kernel(%arg0: i32, %arg1: memref<1x16x256xf32, #tpu.memory_space<vmem>>, %arg2: memref<4x16xf32, #tpu.memory_space<vmem>>, %arg3: memref<4x1xf32, #tpu.memory_space<vmem>>, %arg4: memref<4x1xf32, #tpu.memory_space<vmem>>, %arg5: memref<4x36xf32, #tpu.memory_space<vmem>>, %arg6: memref<4x1xf32, #tpu.memory_space<vmem>>, %arg7: memref<4x1xf32, #tpu.memory_space<vmem>>, %arg8: memref<16x4xf32, #tpu.memory_space<vmem>>, %arg9: memref<16x1xf32, #tpu.memory_space<vmem>>, %arg10: memref<16x1xf32, #tpu.memory_space<vmem>>, %arg11: memref<1x16x256xf32, #tpu.memory_space<vmem>>, %arg12: memref<36x256xf32, #tpu.memory_space<vmem>>) attributes {dimension_semantics = [#tpu.dimension_semantics<parallel>], iteration_bounds = array<i64: 2>, scalar_prefetch = 0 : i64, scratch_operands = 1 : i64, tpu.core_type = #tpu.core_type<tc>, window_params = [{transform_indices = @transform_0, window_bounds = array<i64: 1, 16, 256>}, {pipeline_mode = #tpu.pipeline_mode<synchronous>, transform_indices = @transform_1, window_bounds = array<i64: 4, 16>}, {pipeline_mode = #tpu.pipeline_mode<synchronous>, transform_indices = @transform_2, window_bounds = array<i64: 4, 1>}, {pipeline_mode = #tpu.pipeline_mode<synchronous>, transform_indices = @transform_3, window_bounds = array<i64: 4, 1>}, {pipeline_mode = #tpu.pipeline_mode<synchronous>, transform_indices = @transform_4, window_bounds = array<i64: 4, 36>}, {pipeline_mode = #tpu.pipeline_mode<synchronous>, transform_indices = @transform_5, window_bounds = array<i64: 4, 1>}, {pipeline_mode = #tpu.pipeline_mode<synchronous>, transform_indices = @transform_6, window_bounds = array<i64: 4, 1>}, {pipeline_mode = #tpu.pipeline_mode<synchronous>, transform_indices = @transform_7, window_bounds = array<i64: 16, 4>}, {pipeline_mode = #tpu.pipeline_mode<synchronous>, transform_indices = @transform_8, window_bounds = array<i64: 16, 1>}, {pipeline_mode = #tpu.pipeline_mode<synchronous>, transform_indices = @transform_9, window_bounds = array<i64: 16, 1>}, {transform_indices = @transform_10, window_bounds = array<i64: 1, 16, 256>}]} {
    %c0 = arith.constant 0 : index
    %c0_0 = arith.constant 0 : index
    %c0_1 = arith.constant 0 : index
    %0 = vector.load %arg1[%c0, %c0_0, %c0_1] : memref<1x16x256xf32, #tpu.memory_space<vmem>>, vector<1x16x256xf32>
    %1 = vector.shape_cast %0 : vector<1x16x256xf32> to vector<16x256xf32>
    %c0_2 = arith.constant 0 : index
    %c0_3 = arith.constant 0 : index
    %2 = vector.load %arg2[%c0_2, %c0_3] : memref<4x16xf32, #tpu.memory_space<vmem>>, vector<4x16xf32>
    %cst = arith.constant dense<0.000000e+00> : vector<4x256xf32>
    %3 = tpu.matmul %2, %1, %cst {dimension_numbers = #tpu.dot_dimension_numbers<[1], [0], [0], [1], [0, 0, 1, 1], [], []>} : vector<4x16xf32>, vector<16x256xf32>, vector<4x256xf32> -> vector<4x256xf32>
    %c0_4 = arith.constant 0 : index
    %c0_5 = arith.constant 0 : index
    %4 = vector.load %arg3[%c0_4, %c0_5] : memref<4x1xf32, #tpu.memory_space<vmem>>, vector<4x1xf32>
    %5 = vector.broadcast %4 : vector<4x1xf32> to vector<4x256xf32>
    %6 = arith.mulf %3, %5 : vector<4x256xf32>
    %c0_6 = arith.constant 0 : index
    %c0_7 = arith.constant 0 : index
    %7 = vector.load %arg4[%c0_6, %c0_7] : memref<4x1xf32, #tpu.memory_space<vmem>>, vector<4x1xf32>
    %8 = vector.broadcast %7 : vector<4x1xf32> to vector<4x256xf32>
    %9 = arith.addf %6, %8 : vector<4x256xf32>
    %cst_8 = arith.constant 0.000000e+00 : f32
    %10 = vector.broadcast %cst_8 : f32 to vector<4x256xf32>
    %11 = arith.maximumf %9, %10 : vector<4x256xf32>
    %12 = tpu.iota {dimensions = array<i32: 1>} : vector<4x256xi32>
    %c16_i32 = arith.constant 16 : i32
    %c0_i32 = arith.constant 0 : i32
    %13 = arith.cmpi eq, %c16_i32, %c0_i32 : i32
    %c1_i32 = arith.constant 1 : i32
    %14 = arith.select %13, %c1_i32, %c16_i32 : i32
    %15 = vector.broadcast %14 : i32 to vector<4x256xi32>
    %16 = arith.remsi %12, %15 : vector<4x256xi32>
    %c0_i32_9 = arith.constant 0 : i32
    %17 = vector.broadcast %c0_i32_9 : i32 to vector<4x256xi32>
    %18 = arith.cmpi ne, %16, %17 : vector<4x256xi32>
    %c0_i32_10 = arith.constant 0 : i32
    %19 = vector.broadcast %c0_i32_10 : i32 to vector<4x256xi32>
    %20 = arith.cmpi slt, %16, %19 : vector<4x256xi32>
    %c0_i32_11 = arith.constant 0 : i32
    %21 = arith.cmpi slt, %14, %c0_i32_11 : i32
    %22 = vector.broadcast %21 : i1 to vector<4x256xi1>
    %23 = vector.broadcast %22 : vector<4x256xi1> to vector<4x256xi1>
    %24 = arith.xori %20, %23 : vector<4x256xi1>
    %25 = arith.andi %24, %18 : vector<4x256xi1>
    %26 = vector.broadcast %14 : i32 to vector<4x256xi32>
    %27 = arith.addi %16, %26 : vector<4x256xi32>
    %28 = arith.select %25, %27, %16 : vector<4x256xi1>, vector<4x256xi32>
    %29 = vector.extract_strided_slice %11 {offsets = [0, 0], sizes = [4, 16], strides = [1, 1]} : vector<4x256xf32> to vector<4x16xf32>
    %30 = vector.extract_strided_slice %11 {offsets = [0, 0], sizes = [4, 240], strides = [1, 1]} : vector<4x256xf32> to vector<4x240xf32>
    %31 = tpu.concatenate %29, %30 in 1 : vector<4x16xf32>, vector<4x240xf32> -> vector<4x256xf32>
    %32 = vector.extract_strided_slice %31 {offsets = [0, 0], sizes = [4, 1], strides = [1, 1]} : vector<4x256xf32> to vector<4x1xf32>
    %33 = vector.extract_strided_slice %31 {offsets = [0, 0], sizes = [4, 255], strides = [1, 1]} : vector<4x256xf32> to vector<4x255xf32>
    %34 = tpu.concatenate %32, %33 in 1 : vector<4x1xf32>, vector<4x255xf32> -> vector<4x256xf32>
    %c0_i32_12 = arith.constant 0 : i32
    %35 = vector.broadcast %c0_i32_12 : i32 to vector<4x256xi32>
    %36 = arith.cmpi eq, %28, %35 : vector<4x256xi32>
    %37 = arith.select %36, %31, %34 : vector<4x256xi1>, vector<4x256xf32>
    %c0_13 = arith.constant 0 : index
    %c0_14 = arith.constant 0 : index
    %38 = vector.load %arg12[%c0_13, %c0_14] : memref<36x256xf32, #tpu.memory_space<vmem>>, vector<4x256xf32>
    tpu.vector_store %arg12[%c0_13, %c0_14], %37 {strides = array<i32>} : memref<36x256xf32, #tpu.memory_space<vmem>>, vector<4x256xf32>,
    %c4 = arith.constant 4 : index
    %c0_15 = arith.constant 0 : index
    %39 = vector.load %arg12[%c4, %c0_15] : memref<36x256xf32, #tpu.memory_space<vmem>>, vector<4x256xf32>
    tpu.vector_store %arg12[%c4, %c0_15], %31 {strides = array<i32>} : memref<36x256xf32, #tpu.memory_space<vmem>>, vector<4x256xf32>,
    %40 = vector.extract_strided_slice %31 {offsets = [0, 1], sizes = [4, 255], strides = [1, 1]} : vector<4x256xf32> to vector<4x255xf32>
    %41 = vector.extract_strided_slice %31 {offsets = [0, 0], sizes = [4, 1], strides = [1, 1]} : vector<4x256xf32> to vector<4x1xf32>
    %42 = tpu.concatenate %40, %41 in 1 : vector<4x255xf32>, vector<4x1xf32> -> vector<4x256xf32>
    %c15_i32 = arith.constant 15 : i32
    %43 = vector.broadcast %c15_i32 : i32 to vector<4x256xi32>
    %44 = arith.cmpi eq, %28, %43 : vector<4x256xi32>
    %45 = arith.select %44, %31, %42 : vector<4x256xi1>, vector<4x256xf32>
    %c8 = arith.constant 8 : index
    %c0_16 = arith.constant 0 : index
    %46 = vector.load %arg12[%c8, %c0_16] : memref<36x256xf32, #tpu.memory_space<vmem>>, vector<4x256xf32>
    tpu.vector_store %arg12[%c8, %c0_16], %45 {strides = array<i32>} : memref<36x256xf32, #tpu.memory_space<vmem>>, vector<4x256xf32>,
    %47 = vector.extract_strided_slice %11 {offsets = [0, 0], sizes = [4, 1], strides = [1, 1]} : vector<4x256xf32> to vector<4x1xf32>
    %48 = vector.extract_strided_slice %11 {offsets = [0, 0], sizes = [4, 255], strides = [1, 1]} : vector<4x256xf32> to vector<4x255xf32>
    %49 = tpu.concatenate %47, %48 in 1 : vector<4x1xf32>, vector<4x255xf32> -> vector<4x256xf32>
    %c0_i32_17 = arith.constant 0 : i32
    %50 = vector.broadcast %c0_i32_17 : i32 to vector<4x256xi32>
    %51 = arith.cmpi eq, %28, %50 : vector<4x256xi32>
    %52 = arith.select %51, %11, %49 : vector<4x256xi1>, vector<4x256xf32>
    %c12 = arith.constant 12 : index
    %c0_18 = arith.constant 0 : index
    %53 = vector.load %arg12[%c12, %c0_18] : memref<36x256xf32, #tpu.memory_space<vmem>>, vector<4x256xf32>
    tpu.vector_store %arg12[%c12, %c0_18], %52 {strides = array<i32>} : memref<36x256xf32, #tpu.memory_space<vmem>>, vector<4x256xf32>,
    %c16 = arith.constant 16 : index
    %c0_19 = arith.constant 0 : index
    %54 = vector.load %arg12[%c16, %c0_19] : memref<36x256xf32, #tpu.memory_space<vmem>>, vector<4x256xf32>
    tpu.vector_store %arg12[%c16, %c0_19], %11 {strides = array<i32>} : memref<36x256xf32, #tpu.memory_space<vmem>>, vector<4x256xf32>,
    %55 = vector.extract_strided_slice %11 {offsets = [0, 1], sizes = [4, 255], strides = [1, 1]} : vector<4x256xf32> to vector<4x255xf32>
    %56 = vector.extract_strided_slice %11 {offsets = [0, 0], sizes = [4, 1], strides = [1, 1]} : vector<4x256xf32> to vector<4x1xf32>
    %57 = tpu.concatenate %55, %56 in 1 : vector<4x255xf32>, vector<4x1xf32> -> vector<4x256xf32>
    %c15_i32_20 = arith.constant 15 : i32
    %58 = vector.broadcast %c15_i32_20 : i32 to vector<4x256xi32>
    %59 = arith.cmpi eq, %28, %58 : vector<4x256xi32>
    %60 = arith.select %59, %11, %57 : vector<4x256xi1>, vector<4x256xf32>
    %c20 = arith.constant 20 : index
    %c0_21 = arith.constant 0 : index
    %61 = vector.load %arg12[%c20, %c0_21] : memref<36x256xf32, #tpu.memory_space<vmem>>, vector<4x256xf32>
    tpu.vector_store %arg12[%c20, %c0_21], %60 {strides = array<i32>} : memref<36x256xf32, #tpu.memory_space<vmem>>, vector<4x256xf32>,
    %62 = vector.extract_strided_slice %11 {offsets = [0, 16], sizes = [4, 240], strides = [1, 1]} : vector<4x256xf32> to vector<4x240xf32>
    %63 = vector.extract_strided_slice %11 {offsets = [0, 240], sizes = [4, 16], strides = [1, 1]} : vector<4x256xf32> to vector<4x16xf32>
    %64 = tpu.concatenate %62, %63 in 1 : vector<4x240xf32>, vector<4x16xf32> -> vector<4x256xf32>
    %65 = vector.extract_strided_slice %64 {offsets = [0, 0], sizes = [4, 1], strides = [1, 1]} : vector<4x256xf32> to vector<4x1xf32>
    %66 = vector.extract_strided_slice %64 {offsets = [0, 0], sizes = [4, 255], strides = [1, 1]} : vector<4x256xf32> to vector<4x255xf32>
    %67 = tpu.concatenate %65, %66 in 1 : vector<4x1xf32>, vector<4x255xf32> -> vector<4x256xf32>
    %c0_i32_22 = arith.constant 0 : i32
    %68 = vector.broadcast %c0_i32_22 : i32 to vector<4x256xi32>
    %69 = arith.cmpi eq, %28, %68 : vector<4x256xi32>
    %70 = arith.select %69, %64, %67 : vector<4x256xi1>, vector<4x256xf32>
    %c24 = arith.constant 24 : index
    %c0_23 = arith.constant 0 : index
    %71 = vector.load %arg12[%c24, %c0_23] : memref<36x256xf32, #tpu.memory_space<vmem>>, vector<4x256xf32>
    tpu.vector_store %arg12[%c24, %c0_23], %70 {strides = array<i32>} : memref<36x256xf32, #tpu.memory_space<vmem>>, vector<4x256xf32>,
    %c28 = arith.constant 28 : index
    %c0_24 = arith.constant 0 : index
    %72 = vector.load %arg12[%c28, %c0_24] : memref<36x256xf32, #tpu.memory_space<vmem>>, vector<4x256xf32>
    tpu.vector_store %arg12[%c28, %c0_24], %64 {strides = array<i32>} : memref<36x256xf32, #tpu.memory_space<vmem>>, vector<4x256xf32>,
    %73 = vector.extract_strided_slice %64 {offsets = [0, 1], sizes = [4, 255], strides = [1, 1]} : vector<4x256xf32> to vector<4x255xf32>
    %74 = vector.extract_strided_slice %64 {offsets = [0, 0], sizes = [4, 1], strides = [1, 1]} : vector<4x256xf32> to vector<4x1xf32>
    %75 = tpu.concatenate %73, %74 in 1 : vector<4x255xf32>, vector<4x1xf32> -> vector<4x256xf32>
    %c15_i32_25 = arith.constant 15 : i32
    %76 = vector.broadcast %c15_i32_25 : i32 to vector<4x256xi32>
    %77 = arith.cmpi eq, %28, %76 : vector<4x256xi32>
    %78 = arith.select %77, %64, %75 : vector<4x256xi1>, vector<4x256xf32>
    %c32 = arith.constant 32 : index
    %c0_26 = arith.constant 0 : index
    %79 = vector.load %arg12[%c32, %c0_26] : memref<36x256xf32, #tpu.memory_space<vmem>>, vector<4x256xf32>
    tpu.vector_store %arg12[%c32, %c0_26], %78 {strides = array<i32>} : memref<36x256xf32, #tpu.memory_space<vmem>>, vector<4x256xf32>,
    %c0_27 = arith.constant 0 : index
    %c0_28 = arith.constant 0 : index
    %80 = vector.load %arg5[%c0_27, %c0_28] : memref<4x36xf32, #tpu.memory_space<vmem>>, vector<4x36xf32>
    %c0_29 = arith.constant 0 : index
    %c0_30 = arith.constant 0 : index
    %81 = vector.load %arg12[%c0_29, %c0_30] : memref<36x256xf32, #tpu.memory_space<vmem>>, vector<36x256xf32>
    %cst_31 = arith.constant dense<0.000000e+00> : vector<4x256xf32>
    %82 = tpu.matmul %80, %81, %cst_31 {dimension_numbers = #tpu.dot_dimension_numbers<[1], [0], [0], [1], [0, 0, 1, 1], [], []>} : vector<4x36xf32>, vector<36x256xf32>, vector<4x256xf32> -> vector<4x256xf32>
    %c0_32 = arith.constant 0 : index
    %c0_33 = arith.constant 0 : index
    %83 = vector.load %arg6[%c0_32, %c0_33] : memref<4x1xf32, #tpu.memory_space<vmem>>, vector<4x1xf32>
    %84 = vector.broadcast %83 : vector<4x1xf32> to vector<4x256xf32>
    %85 = arith.mulf %82, %84 : vector<4x256xf32>
    %c0_34 = arith.constant 0 : index
    %c0_35 = arith.constant 0 : index
    %86 = vector.load %arg7[%c0_34, %c0_35] : memref<4x1xf32, #tpu.memory_space<vmem>>, vector<4x1xf32>
    %87 = vector.broadcast %86 : vector<4x1xf32> to vector<4x256xf32>
    %88 = arith.addf %85, %87 : vector<4x256xf32>
    %cst_36 = arith.constant 0.000000e+00 : f32
    %89 = vector.broadcast %cst_36 : f32 to vector<4x256xf32>
    %90 = arith.maximumf %88, %89 : vector<4x256xf32>
    %c0_37 = arith.constant 0 : index
    %c0_38 = arith.constant 0 : index
    %91 = vector.load %arg8[%c0_37, %c0_38] : memref<16x4xf32, #tpu.memory_space<vmem>>, vector<16x4xf32>
    %cst_39 = arith.constant dense<0.000000e+00> : vector<16x256xf32>
    %92 = tpu.matmul %91, %90, %cst_39 {dimension_numbers = #tpu.dot_dimension_numbers<[1], [0], [0], [1], [0, 0, 1, 1], [], []>} : vector<16x4xf32>, vector<4x256xf32>, vector<16x256xf32> -> vector<16x256xf32>
    %c0_40 = arith.constant 0 : index
    %c0_41 = arith.constant 0 : index
    %93 = vector.load %arg9[%c0_40, %c0_41] : memref<16x1xf32, #tpu.memory_space<vmem>>, vector<16x1xf32>
    %94 = vector.broadcast %93 : vector<16x1xf32> to vector<16x256xf32>
    %95 = arith.mulf %92, %94 : vector<16x256xf32>
    %c0_42 = arith.constant 0 : index
    %c0_43 = arith.constant 0 : index
    %96 = vector.load %arg10[%c0_42, %c0_43] : memref<16x1xf32, #tpu.memory_space<vmem>>, vector<16x1xf32>
    %97 = vector.broadcast %96 : vector<16x1xf32> to vector<16x256xf32>
    %98 = arith.addf %95, %97 : vector<16x256xf32>
    %99 = arith.addf %98, %1 : vector<16x256xf32>
    %cst_44 = arith.constant 0.000000e+00 : f32
    %100 = vector.broadcast %cst_44 : f32 to vector<16x256xf32>
    %101 = arith.maximumf %99, %100 : vector<16x256xf32>
    %c0_45 = arith.constant 0 : index
    %c0_46 = arith.constant 0 : index
    %c0_47 = arith.constant 0 : index
    %102 = vector.load %arg11[%c0_45, %c0_46, %c0_47] : memref<1x16x256xf32, #tpu.memory_space<vmem>>, vector<1x16x256xf32>
    %103 = vector.shape_cast %102 : vector<1x16x256xf32> to vector<16x256xf32>
    %104 = vector.shape_cast %101 : vector<16x256xf32> to vector<1x16x256xf32>
    tpu.vector_store %arg11[%c0_45, %c0_46, %c0_47], %104 {strides = array<i32>} : memref<1x16x256xf32, #tpu.memory_space<vmem>>, vector<1x16x256xf32>,
    return
  }
  func.func @transform_0(%arg0: i32) -> (i32, i32, i32) {
    %c0_i32 = arith.constant 0 : i32
    %c0_i32_0 = arith.constant 0 : i32
    %c0_i32_1 = arith.constant 0 : i32
    return %arg0, %c0_i32, %c0_i32_0 : i32, i32, i32
  }
  func.func @transform_1(%arg0: i32) -> (i32, i32) {
    %c0_i32 = arith.constant 0 : i32
    %c0_i32_0 = arith.constant 0 : i32
    %c0_i32_1 = arith.constant 0 : i32
    return %c0_i32, %c0_i32_0 : i32, i32
  }
  func.func @transform_2(%arg0: i32) -> (i32, i32) {
    %c0_i32 = arith.constant 0 : i32
    %c0_i32_0 = arith.constant 0 : i32
    %c0_i32_1 = arith.constant 0 : i32
    return %c0_i32, %c0_i32_0 : i32, i32
  }
  func.func @transform_3(%arg0: i32) -> (i32, i32) {
    %c0_i32 = arith.constant 0 : i32
    %c0_i32_0 = arith.constant 0 : i32
    %c0_i32_1 = arith.constant 0 : i32
    return %c0_i32, %c0_i32_0 : i32, i32
  }
  func.func @transform_4(%arg0: i32) -> (i32, i32) {
    %c0_i32 = arith.constant 0 : i32
    %c0_i32_0 = arith.constant 0 : i32
    %c0_i32_1 = arith.constant 0 : i32
    return %c0_i32, %c0_i32_0 : i32, i32
  }
  func.func @transform_5(%arg0: i32) -> (i32, i32) {
    %c0_i32 = arith.constant 0 : i32
    %c0_i32_0 = arith.constant 0 : i32
    %c0_i32_1 = arith.constant 0 : i32
    return %c0_i32, %c0_i32_0 : i32, i32
  }
  func.func @transform_6(%arg0: i32) -> (i32, i32) {
    %c0_i32 = arith.constant 0 : i32
    %c0_i32_0 = arith.constant 0 : i32
    %c0_i32_1 = arith.constant 0 : i32
    return %c0_i32, %c0_i32_0 : i32, i32
  }
  func.func @transform_7(%arg0: i32) -> (i32, i32) {
    %c0_i32 = arith.constant 0 : i32
    %c0_i32_0 = arith.constant 0 : i32
    %c0_i32_1 = arith.constant 0 : i32
    return %c0_i32, %c0_i32_0 : i32, i32
  }
  func.func @transform_8(%arg0: i32) -> (i32, i32) {
    %c0_i32 = arith.constant 0 : i32
    %c0_i32_0 = arith.constant 0 : i32
    %c0_i32_1 = arith.constant 0 : i32
    return %c0_i32, %c0_i32_0 : i32, i32
  }
  func.func @transform_9(%arg0: i32) -> (i32, i32) {
    %c0_i32 = arith.constant 0 : i32
    %c0_i32_0 = arith.constant 0 : i32
    %c0_i32_1 = arith.constant 0 : i32
    return %c0_i32, %c0_i32_0 : i32, i32
  }
  func.func @transform_10(%arg0: i32) -> (i32, i32, i32) {
    %c0_i32 = arith.constant 0 : i32
    %c0_i32_0 = arith.constant 0 : i32
    %c0_i32_1 = arith.constant 0 : i32
    return %arg0, %c0_i32, %c0_i32_0 : i32, i32, i32
  }
}

</mosaic_0001>

<bundles_post_ra>
// kernel: tpu_custom_call.1
= control target key start
LH: loop header
LB: loop body
LE: loop exit
PB: predicated region body
PF: predicated region fallthrough
CT: control target
= control target key end

     0   :  { %15 = vsyncpa [#allocation4], 0  ;;  %s1411_s0 = inlined_call_operand.hbm [shape: f32[2,16,256], index: 0, kind: input, shape index: {}]   ;;  %s1412_s1 = inlined_call_operand.vmem [shape: f32[4,16], index: 1, kind: input, shape index: {}]   ;;  %s1413_s2 = inlined_call_operand.vmem [shape: f32[4,1], index: 2, kind: input, shape index: {}]   ;;  %s1414_s3 = inlined_call_operand.vmem [shape: f32[4,1], index: 3, kind: input, shape index: {}]   ;;  %s1415_s4 = inlined_call_operand.vmem [shape: f32[4,36], index: 4, kind: input, shape index: {}]   ;;  %s1416_s5 = inlined_call_operand.vmem [shape: f32[4,1], index: 5, kind: input, shape index: {}]   ;;  %s1417_s6 = inlined_call_operand.vmem [shape: f32[4,1], index: 6, kind: input, shape index: {}]   ;;  %s1418_s7 = inlined_call_operand.vmem [shape: f32[16,4], index: 7, kind: input, shape index: {}]   ;;  %s1419_s8 = inlined_call_operand.vmem [shape: f32[16,1], index: 8, kind: input, shape index: {}]   ;;  %s1420_s9 = inlined_call_operand.vmem [shape: f32[16,1], index: 9, kind: input, shape index: {}]   ;;  %s1421_s10 = inlined_call_operand.hbm [shape: f32[2,16,256], index: 10, kind: output, shape index: {}]  }
   0x1   :  { %17 = vsyncpa [#allocation4 + $0x1], 0 }
   0x2   :  { %18 = vsyncpa [#allocation5], 0 }
   0x3   :  { %20 = vsyncpa [#allocation5 + $0x1], 0  ;;  %s1123_s13 = smov 0   ;;  %s1125_s14 = smov 0  }
   0x4   :  { %s1127_s15 = smov 0   ;;  %s1129_s16 = smov 0  }
   0x5 LB: > { %1426 = sst [smem:[#allocation9_spill]] %s1054_s15  ;;  %s1144_s17 = sadd.s32 4294967295, %s1058_s16   ;;  %s1058_s16 = sphi %s1129_s16, %s1445_s16   ;;  %s1054_s15 = sphi %s1127_s15, %s1447_s15   ;;  %s1050_s14 = sphi %s1125_s14, %s1449_s14   ;;  %s1046_s13 = sphi %s1123_s13, %s1448_s13  }
   0x6   : > { %s876_s18 = sadd.s32 4294967294, %s1058_s16   ;;  %s1148_s19 = sadd.s32 1, %s1058_s16  }
   0x7   : > { %1427 = sst [smem:[#allocation10_spill]] %s1148_s19  ;;  %s33_s20 = sadd.s32 1, %s1054_s15 }
   0x8   : > { %s30_s21 = ssub.s32 %s1058_s16, %s1148_s19  ;;  %p40_p0 = scmp.ne.s32.totalorder %s1054_s15, %s1050_s14 }
   0x9   : > { %p31_p1 = scmp.eq.s32.totalorder %s30_s21, 0  ;;  %p41_p2 = scmp.eq.s32.totalorder %s1058_s16, 0 }
   0xa   : > { %p46_p3 = scmp.ne.s32.totalorder %s1050_s14, %s1046_s13  ;;  %p47_p4 = scmp.eq.s32.totalorder %s1144_s17, 0 }
   0xb   : > { %s1160_s22 = scalar_select %p31_p1, %s1054_s15, %s33_s20  }
   0xc   : > { %p1162_p5 = por %p41_p2, %p40_p0  ;;  %p1166_p6 = por %p47_p4, %p46_p3 }
   0xd   : > { %1428 = sst [smem:[#allocation11_spill]] %s1160_s22  ;;  %p259_p7 = scmp.eq.s32.totalorder %s1144_s17, 1 }
   0xe   : > { %p265_p8 = scmp.eq.s32.totalorder %s876_s18, 1  ;;  %p917_p10 = scmp.lt.s32.totalorder %s1058_s16, 2 }
   0xf   : > { %p1173_p11 = por %p259_p7, %p40_p0  ;;  %s312_s27 = sand.u32 1, %s1054_s15  }
  0x10   : > { %p1177_p12 = por %p265_p8, %p46_p3  ;;  %s902_s28 = sshll.u32 %s1058_s16, 5 }
  0x11   : > { %s879_s29 = sshll.u32 %s312_s27, 5  ;;  %s321_s12 = scalar_lea.hbm %s1411_s0, %s902_s28 }
  0x12   : > { %s1432_s26 = scalar_select %p1177_p12, 1, 0 }
  0x13   : > { %s322_s20 = sshll.u32 %s321_s12, 4  ;;  %s316_s18 = scalar_lea.vmem [#allocation3], %s879_s29  ;;  %s323_s20 = int_to_ptr.hbm [resolvable:$true] %s322_s20 }
  0x14   : > { %1433 = sst [smem:[#allocation12_spill]] %s1432_s26  ;;  %s324_s21 = sshll.u32 %s316_s18, 4  ;;  %s325_s21 = int_to_ptr.vmem [resolvable:$true] %s324_s21 }
  0x15   : > { %p1188_p13 = pnand %p917_p10, %p1162_p5  ;;  %p882_p0 = scmp.ge.s32.totalorder %s1058_s16, 1 }
  0x16   : > { %p332_p1 = scmp.lt.s32.totalorder %s1058_s16, 3  ;;  %s313_s15 = scalar_lea.sflag [#allocation4], %s312_s27 }
  0x17   : > { %s962_s19 = sshra.s32 %s323_s20, 4  ;;  %p966_p3 = pneg %p1188_p13  ;;  %s963_s19 = int_to_ptr.hbm [resolvable:$true] %s962_s19 }
  0x18   : > { %s964_s26 = scalar_lea.hbm %s963_s19, 32  ;;  %s969_s23 = scalar_lea.hbm %s1411_s0, 64 }
  0x19   : > { %p965_p2 = scmp.ne.s32.totalorder %s963_s19, %s964_s26  ;;  %p970_p5 = scmp.lt.s32.totalorder %s963_s19, %s1411_s0 }
  0x1a   : > { %p971_p8 = scmp.lt.s32.totalorder %s969_s23, %s964_s26 }
  0x1b   : > { %p967_p4 = pnand %p966_p3, %p965_p2 }
  0x1c   : > { %p972_p10 = por %p971_p8, %p970_p5 }
  0x1d   : > { %p968_p7 = pneg %p967_p4 }
  0x1f   : > { %p973_p9 = pnand %p972_p10, %p968_p7 }
  0x21   : > { %976 = shalt.err (!%p973_p9)
}
  0x22   : > { %s1060_s27 = smov 256   ;;  %s1061_s12 = smov 16  }
  0x23   : > { %912 = dma.hbm_to_vmem [thread:$0]  (!%p1188_p13), %s323_s20, 512, %s325_s21, %s313_s15, %s1060_s27, %s1060_s27, %s1061_s12  }
  0x24   : > { %p333_p2 = pnand %p882_p0, %p332_p1 }
  0x25   : > { %s1209_s18 = sand.u32 (!%p333_p2), 1, %s1050_s14  }
  0x26   : > { %336 = sbr.rel (%p333_p2) target bundleno = 748 (0x2ec), region = 60  ;;  %s883_s19 = sshll.u32 (!%p333_p2), %s1209_s18, 5 }
  0x27   : > { %s339_s26 = scalar_lea.sflag (!%p333_p2), [#allocation4], %s1209_s18  ;;  %s342_s28 = scalar_lea.vmem (!%p333_p2), [#allocation3], %s883_s19 }
  0x2b   : > { %1037 = dma.done.wait (%p1166_p6), %s339_s26, 512  }
  0x2c   : > { %1039 = vsyncadd (%p1166_p6), %s339_s26, 4294966784  ;;  %v1062_v0 = vmov 0   ;;  %v1219_v1 = vld [vmem:[%s342_s28 + $0x10] sm:$0xff]  ;;  %v1221_v2 = vld [vmem:[%s342_s28 + $0x18] sm:$0xff]  ;;  %vm385_vm0 = vcmask 130048   ;;  %s1063_s23 = smov 127   ;;  %v447_v20 = vlaneseq }
  0x2d   : > { %959 = vset.pattern.permute.xlu0 %v1062_v0  ;;  %960 = vset.pattern.permute.xlu1 %v1062_v0  ;;  %v1223_v3 = vld [vmem:[%s342_s28] sm:$0xff]  ;;  %v1227_v4 = vld [vmem:[%s342_s28 + $0x8] sm:$0xff]  ;;  %v384_v5 = vld [vmem:[%s1412_s1] sm:$0xf]  ;;  %s1064_s30 = smov 16   ;;  %s1065_s11 = smov 112  }
  0x2e   : > { %961 = vset.pattern.permute.xlu2 %v1062_v0  ;;  %403 = vmatpush.msra.mxu2 %v1219_v1  ;;  %v429_v6 = vld [vmem:[%s1413_s2] sm:$0xf]  ;;  %s1066_s27 = smov 1   ;;  %v448_v22 = vand.u32 127, %v447_v20  ;;  %vm510_vm1 = vcmask 1039360   ;;  %vm489_vm4 = vcmask 7168  }
  0x2f   : > { %423 = vmatpush.msra.mxu1 %v1221_v2  ;;  %432 = vperm.xlu0 %959, %v429_v6   ;;  %v437_v7 = vld [vmem:[%s1414_s3] sm:$0xf]  ;;  %vm565_vm6 = vcmask 916480   ;;  %v744_v51 = vld [vmem:[%s1419_s8 + $0x8] sm:$0xff]  ;;  %vm617_vm8 = vcmask 1043456   ;;  %vm613_vm9 = vcmask 293888  }
  0x30   : > { %404 = vmatpush.msra.mxu2 %v1223_v3  ;;  %v449_v25 = vadd.s32 128, %v448_v22  ;;  %v454_v27 = vand.u32 15, %v448_v22  ;;  %v664_v50 = vld [vmem:[%s1416_s5] sm:$0xf]  ;;  %vm684_vm10 = vcmask 31744   ;;  %s379_s20 = scalar_lea.vmem [#allocation6], %s883_s19 }
  0x31   : > { %424 = vmatpush.msra.mxu1 %v1227_v4  ;;  %885 = vmatmul.msk.f32.vlgmr.msra.gmra.mxu2 %vm385_vm0, %v384_v5  ;;  %s903_s21 = sshll.u32 %s1144_s17, 5  ;;  %s788_s17 = scalar_lea.sflag [#allocation5], %s1209_s18 }
  0x32   : > { %886 = vmatmul.msk.f32.vlgmr.msra.gmra.mxu1 %vm385_vm0, %v384_v5  ;;  %v461_v28 = vand.u32 15, %v449_v25  ;;  %vm1265_vm2 = vcmp.eq.s32.totalorder %v454_v27, 15  ;;  %vm1280_vm5 = vcmp.eq.s32.totalorder %v454_v27, 0  ;;  %s799_s19 = scalar_lea.hbm %s1421_s10, %s903_s21  ;;  %s1012_s22 = scalar_lea.hbm %s1421_s10, 64 }
  0x34   : > { %vm1269_vm3 = vcmp.eq.s32.totalorder %v461_v28, 15  ;;  %vm1312_vm7 = vcmp.eq.s32.totalorder %v461_v28, 0 }
  0x37   : > { %440 = vperm.xlu0 %959, %v437_v7   ;;  %v672_v7 = vld [vmem:[%s1417_s6] sm:$0xf] }
  0xa1   : > { %v433_v8 = vpop.permute.xlu0 %432 }
  0xa9   : > { %v441_v11 = vpop.permute.xlu0 %440 }
  0xaf   : > { %v426_v9 = vpop.f32.mrf.mxu1 }
  0xb0   : > { %v436_v10 = vmul.f32 %v433_v8, %v426_v9 }
  0xb2   : > { %v444_v12 = vadd.f32 %v441_v11, %v436_v10 }
  0xb4   : > { %v1242_v13 = vmax.f32 %v444_v12, 0.0  ;;  %v406_v14 = vpop.f32.mrf.mxu2  ;;  %v759_v12 = vld [vmem:[%s1420_s9] sm:$0xff] }
  0xb5   : > { %v435_v15 = vmul.f32 %v433_v8, %v406_v14 }
  0xb6   : > { %541 = vst [vmem:[#allocation2 + $0x28] sm:$0xf] %v1242_v13  ;;  %544 = vrot.lane.b32.xlu0 %v1242_v13, %s1063_s23 }
  0xb7   : > { %v443_v16 = vadd.f32 %v441_v11, %v435_v15 }
  0xb9   : > { %v445_v17 = vmax.f32 %v443_v16, 0.0 }
  0xbb   : > { %540 = vst [vmem:[#allocation2 + $0x48] sm:$0xf] %v445_v17  ;;  %476 = vrot.lane.b32.xlu2 %v445_v17, %s1064_s30  ;;  %561 = vrot.lane.b32.xlu1 %v445_v17, %s1065_s11 }
  0xc3   : > { %478 = vrot.lane.b32.xlu2 %v1242_v13, %s1064_s30  ;;  %563 = vrot.lane.b32.xlu1 %v1242_v13, %s1065_s11  ;;  %s800_s11 = sshll.u32 %s379_s20, 4  ;;  %s801_s11 = int_to_ptr.vmem [resolvable:$true] %s800_s11 }
  0xcb   : > { %542 = vrot.lane.b32.xlu2 %v445_v17, %s1063_s23 }
  0xd3   : > { %522 = vrot.lane.b32.xlu2 %v445_v17, %s1066_s27 }
 0x115   : > { %v477_v18 = vpop.permute.xlu2 %476 }
 0x116   : > { %v1254_v19 = vsel %vm385_vm0, %v445_v17, %v477_v18 }
 0x117   : > { %v500_v21 = vrot.slane %v1254_v19, 4  ;;  %485 = vrot.lane.b32.xlu2 %v1254_v19, %s1066_s27 }
 0x119   : > { %504 = vst [vmem:[#allocation2 + $0x30] sm:$0xf0] %v500_v21 }
 0x11d   : > { %v479_v23 = vpop.permute.xlu2 %478 }
 0x11e   : > { %v1260_v24 = vsel %vm385_vm0, %v477_v18, %v479_v23 }
 0x11f   : > { %v501_v26 = vrot.slane %v1260_v24, 4  ;;  %487 = vrot.lane.b32.xlu2 %v1260_v24, %s1066_s27 }
 0x121   : > { %505 = vst [vmem:[#allocation2] sm:$0xf0] %v501_v26 }
 0x125   : > { %v543_v29 = vpop.permute.xlu2 %542 }
 0x128   : > { %v545_v32 = vpop.permute.xlu0 %544 }
 0x129   : > { %v546_v33 = vsel %vm510_vm1, %v543_v29, %v545_v32  ;;  %v550_v34 = vsel %vm510_vm1, %v545_v32, %v543_v29  ;;  %v602_v29 = vld [vmem:[%s1415_s4] sm:$0xf] }
 0x12a   : > { %v551_v35 = vsel %vm1265_vm2, %v445_v17, %v546_v33  ;;  %v552_v36 = vsel %vm1269_vm3, %v1242_v13, %v550_v34 }
 0x12b   : > { %v555_v37 = vrot.slane %v551_v35, 4  ;;  %v556_v38 = vrot.slane %v552_v36, 4  ;;  %v760_v35 = vld [vmem:[%s1420_s9 + $0x8] sm:$0xff] }
 0x12d   : > { %559 = vst [vmem:[#allocation2 + $0x48] sm:$0xf0] %v555_v37  ;;  %v1284_v40 = vpop.permute.xlu2 %522  ;;  %v562_v41 = vpop.permute.xlu1 %561 }
 0x12e   : > { %560 = vst [vmem:[#allocation2 + $0x28] sm:$0xf0] %v556_v38  ;;  %v529_v42 = vsel %vm489_vm4, %v445_v17, %v1284_v40 }
 0x12f   : > { %v530_v43 = vsel %vm1280_vm5, %v445_v17, %v529_v42  ;;  %v682_v42 = vld [vmem:[%s1418_s7] sm:$0xff] }
 0x130   : > { %v534_v44 = vrot.slane %v530_v43, 4 }
 0x132   : > { %538 = vst [vmem:[#allocation2 + $0x18] sm:$0xf0] %v534_v44 }
 0x134   : > { %v607_v25 = vld [vmem:[#allocation2 + $0x48] sm:$0xff] }
 0x135   : > { %v564_v45 = vpop.permute.xlu1 %563  ;;  %v608_v32 = vld [vmem:[#allocation2 + $0x28] sm:$0xff] }
 0x136   : > { %v566_v46 = vsel %vm565_vm6, %v562_v41, %v564_v45  ;;  %v569_v47 = vsel %vm565_vm6, %v564_v45, %v1242_v13 }
 0x137   : > { %v583_v48 = vrot.slane %v566_v46, 4  ;;  %v584_v49 = vrot.slane %v569_v47, 4  ;;  %591 = vrot.lane.b32.xlu1 %v569_v47, %s1063_s23  ;;  %589 = vrot.lane.b32.xlu0 %v566_v46, %s1063_s23 }
 0x139   : > { %587 = vst [vmem:[#allocation2 + $0x8] sm:$0xf0] %v583_v48 }
 0x13a   : > { %588 = vst [vmem:[#allocation2 + $0x20] sm:$0xf0] %v584_v49 }
 0x13f   : > { %571 = vrot.lane.b32.xlu1 %v566_v46, %s1066_s27  ;;  %506 = vrot.lane.b32.xlu0 %v1254_v19, %s1063_s23 }
 0x147   : > { %508 = vrot.lane.b32.xlu1 %v1260_v24, %s1063_s23  ;;  %573 = vrot.lane.b32.xlu0 %v569_v47, %s1066_s27 }
 0x14f   : > { %524 = vrot.lane.b32.xlu1 %v1242_v13, %s1066_s27  ;;  %667 = vperm.xlu0 %959, %v664_v50   ;;  %s802_s27 = sshll.u32 %s799_s19, 4  ;;  %s803_s27 = int_to_ptr.hbm [resolvable:$true] %s802_s27 }
 0x150   : > { %s1006_s12 = sshra.s32 %s803_s27, 4  ;;  %s1007_s12 = int_to_ptr.hbm [resolvable:$true] %s1006_s12 }
 0x151   : > { %s1008_s26 = scalar_lea.hbm %s1007_s12, 32  ;;  %p1013_p0 = scmp.lt.s32.totalorder %s1007_s12, %s1421_s10 }
 0x152   : > { %p1009_p6 = scmp.ne.s32.totalorder %s1007_s12, %s1008_s26  ;;  %p1014_p1 = scmp.lt.s32.totalorder %s1012_s22, %s1008_s26 }
 0x154   : > { %p1010_p9 = pnand %p1009_p6, %p1173_p11  ;;  %p1015_p3 = por %p1014_p1, %p1013_p0 }
 0x156   : > { %p1011_p13 = pneg %p1010_p9 }
 0x157   : > { %752 = vperm.xlu0 %959, %v744_v51   ;;  %675 = vperm.xlu1 %960, %v672_v7  }
 0x158   : > { %p1016_p4 = pnand %p1015_p3, %p1011_p13 }
 0x15f   : > { %763 = vperm.xlu1 %960, %v759_v12  }
 0x171   : > { %v486_v52 = vpop.permute.xlu2 %485 }
 0x172   : > { %v493_v53 = vsel %vm489_vm4, %v1254_v19, %v486_v52 }
 0x173   : > { %v496_v54 = vsel %vm1280_vm5, %v1254_v19, %v493_v53 }
 0x174   : > { %498 = vst [vmem:[#allocation2 + $0x30] sm:$0xf] %v496_v54 }
 0x179   : > { %v488_v56 = vpop.permute.xlu2 %487 }
 0x17a   : > { %v490_v57 = vsel %vm489_vm4, %v486_v52, %v488_v56 }
 0x17b   : > { %v497_v58 = vsel %vm1312_vm7, %v1260_v24, %v490_v57  ;;  %v603_v31 = vld [vmem:[#allocation2 + $0x30] sm:$0xff] }
 0x17c   : > { %499 = vst [vmem:[#allocation2] sm:$0xf] %v497_v58 }
 0x183   : > { %v604_v34 = vld [vmem:[#allocation2] sm:$0xff] }
 0x1a9   : > { %v592_v59 = vpop.permute.xlu1 %591  ;;  %v590_v60 = vpop.permute.xlu0 %589 }
 0x1aa   : > { %v593_v61 = vsel %vm510_vm1, %v590_v60, %v592_v59  ;;  %v597_v62 = vsel %vm510_vm1, %v592_v59, %v590_v60 }
 0x1ab   : > { %v598_v63 = vsel %vm1265_vm2, %v566_v46, %v593_v61  ;;  %v599_v0 = vsel %vm1269_vm3, %v569_v47, %v597_v62 }
 0x1ac   : > { %600 = vst [vmem:[#allocation2 + $0x40] sm:$0xf] %v598_v63 }
 0x1ad   : > { %601 = vst [vmem:[#allocation2 + $0x38] sm:$0xf] %v599_v0 }
 0x1b1   : > { %v572_v5 = vpop.permute.xlu1 %571  ;;  %v507_v6 = vpop.permute.xlu0 %506 }
 0x1b2   : > { %v578_v8 = vsel %vm489_vm4, %v566_v46, %v572_v5 }
 0x1b3   : > { %v579_v9 = vsel %vm1280_vm5, %v566_v46, %v578_v8  ;;  %v611_v10 = vld [vmem:[#allocation2 + $0x40] sm:$0xf]  ;;  %v683_v46 = vld [vmem:[%s1418_s7 + $0x8] sm:$0xff] }
 0x1b4   : > { %581 = vst [vmem:[#allocation2 + $0x8] sm:$0xf] %v579_v9  ;;  %887 = vmatpush.msk.msrb.mxu2 %vm617_vm8, %v611_v10  ;;  %v612_v11 = vld [vmem:[#allocation2 + $0x38] sm:$0xf] }
 0x1b5   : > { %889 = vmatpush.msk.msra.mxu3 %vm617_vm8, %v612_v11 }
 0x1b9   : > { %v509_v14 = vpop.permute.xlu1 %508  ;;  %v574_v15 = vpop.permute.xlu0 %573 }
 0x1ba   : > { %v511_v16 = vsel %vm510_vm1, %v507_v6, %v509_v14  ;;  %v515_v17 = vsel %vm510_vm1, %v509_v14, %v507_v6  ;;  %v575_v18 = vsel %vm489_vm4, %v572_v5, %v574_v15 }
 0x1bb   : > { %v518_v20 = vsel %vm1265_vm2, %v1254_v19, %v511_v16  ;;  %v519_v21 = vsel %vm1269_vm3, %v1260_v24, %v515_v17  ;;  %v580_v22 = vsel %vm1312_vm7, %v569_v47, %v575_v18  ;;  %v609_v23 = vld [vmem:[#allocation2 + $0x8] sm:$0xff] }
 0x1bc   : > { %520 = vst [vmem:[#allocation2 + $0x18] sm:$0xf] %v518_v20  ;;  %636 = vmatpush.msrb.mxu2 %v609_v23 }
 0x1bd   : > { %521 = vst [vmem:[#allocation2 + $0x10] sm:$0xf] %v519_v21 }
 0x1be   : > { %582 = vst [vmem:[#allocation2 + $0x20] sm:$0xf] %v580_v22  ;;  %637 = vmatpush.msrb.mxu2 %v607_v25 }
 0x1c1   : > { %v525_v26 = vpop.permute.xlu1 %524  ;;  %v668_v36 = vpop.permute.xlu0 %667 }
 0x1c2   : > { %v526_v27 = vsel %vm489_vm4, %v1284_v40, %v525_v26 }
 0x1c3   : > { %v531_v19 = vsel %vm1312_vm7, %v1242_v13, %v526_v27  ;;  %v605_v28 = vld [vmem:[#allocation2 + $0x18] sm:$0xff]  ;;  %v743_v13 = vld [vmem:[%s1419_s8] sm:$0xff] }
 0x1c4   : > { %v535_v24 = vrot.slane %v531_v19, 4  ;;  %638 = vmatpush.msrb.mxu2 %v605_v28  ;;  %747 = vperm.xlu2 %961, %v743_v13  }
 0x1c5   : > { %v610_v30 = vld [vmem:[#allocation2 + $0x20] sm:$0xff] }
 0x1c6   : > { %539 = vst [vmem:[#allocation2 + $0x10] sm:$0xf0] %v535_v24  ;;  %656 = vmatpush.msra.mxu3 %v610_v30  ;;  %639 = vmatpush.msrb.mxu2 %v603_v31 }
 0x1c7   : > { %888 = vmatmul.msk.f32.vlgmr.msrb.gmra.mxu2 %vm613_vm9, %v602_v29 }
 0x1c8   : > { %657 = vmatpush.msra.mxu3 %v608_v32 }
 0x1c9   : > { %v676_v39 = vpop.permute.xlu1 %675  ;;  %v753_v54 = vpop.permute.xlu0 %752 }
 0x1cc   : > { %768 = vperm.xlu2 %961, %v760_v35  }
 0x1cd   : > { %v606_v33 = vld [vmem:[#allocation2 + $0x10] sm:$0xff] }
 0x1ce   : > { %658 = vmatpush.msra.mxu3 %v606_v33 }
 0x1d0   : > { %659 = vmatpush.msra.mxu3 %v604_v34 }
 0x1d1   : > { %890 = vmatmul.msk.f32.vlgmr.msra.gmra.mxu3 %vm613_vm9, %v602_v29  ;;  %v764_v51 = vpop.permute.xlu1 %763 }
 0x21e   : > { %v748_v48 = vpop.permute.xlu2 %747 }
 0x226   : > { %v769_v57 = vpop.permute.xlu2 %768 }
 0x24a   : > { %v641_v37 = vpop.f32.mrf.mxu2 }
 0x24b   : > { %v670_v38 = vmul.f32 %v668_v36, %v641_v37 }
 0x24d   : > { %v678_v40 = vadd.f32 %v676_v39, %v670_v38 }
 0x24f   : > { %v680_v41 = vmax.f32 %v678_v40, 0.0 }
 0x251   : > { %891 = vmatpush.msk.msra.mxu0 %vm617_vm8, %v680_v41 }
 0x252   : > { %892 = vmatmul.msk.f32.vlgmr.msra.gmra.mxu0 %vm684_vm10, %v682_v42 }
 0x254   : > { %v661_v43 = vpop.f32.mrf.mxu3 }
 0x255   : > { %v671_v44 = vmul.f32 %v668_v36, %v661_v43 }
 0x257   : > { %v679_v45 = vadd.f32 %v676_v39, %v671_v44 }
 0x259   : > { %v681_v47 = vmax.f32 %v679_v45, 0.0 }
 0x25a   : > { %893 = vmatmul.msk.f32.gmra.mxu0 %vm684_vm10, %v683_v46 }
 0x25b   : > { %894 = vmatpush.msk.msrb.mxu0 %vm617_vm8, %v681_v47  ;;  %904 = vmatpush.msk.msrb.mxu1 %vm617_vm8, %v681_v47 }
 0x25c   : > { %896 = vmatmul.msk.f32.vlgmr.msrb.gmra.mxu1 %vm684_vm10, %v683_v46 }
 0x262   : > { %895 = vmatmul.msk.f32.vlgmr.msrb.gmra.mxu0 %vm684_vm10, %v682_v42 }
 0x2cf   : > { %v714_v49 = vpop.f32.mrf.mxu0 }
 0x2d0   : > { %v755_v50 = vmul.f32 %v748_v48, %v714_v49 }
 0x2d2   : > { %v771_v52 = vadd.f32 %v764_v51, %v755_v50 }
 0x2d4   : > { %v775_v53 = vadd.f32 %v771_v52, %v1223_v3 }
 0x2d6   : > { %v779_v55 = vmax.f32 %v775_v53, 0.0 }
 0x2d7   : > { %v717_v56 = vpop.f32.mrf.mxu0 }
 0x2d8   : > { %783 = vst [vmem:[%s379_s20] sm:$0xff] %v779_v55  ;;  %v757_v58 = vmul.f32 %v753_v54, %v717_v56 }
 0x2d9   : > { %v740_v59 = vpop.f32.mrf.mxu1 }
 0x2da   : > { %v773_v60 = vadd.f32 %v769_v57, %v757_v58  ;;  %v758_v61 = vmul.f32 %v753_v54, %v740_v59 }
 0x2dc   : > { %v777_v62 = vadd.f32 %v773_v60, %v1219_v1  ;;  %v774_v63 = vadd.f32 %v769_v57, %v758_v61 }
 0x2de   : > { %v781_v0 = vmax.f32 %v777_v62, 0.0  ;;  %v778_v5 = vadd.f32 %v774_v63, %v1221_v2 }
 0x2df   : > { %v737_v3 = vpop.f32.mrf.mxu0 }
 0x2e0   : > { %785 = vst [vmem:[%s379_s20 + $0x10] sm:$0xff] %v781_v0  ;;  %v782_v6 = vmax.f32 %v778_v5, 0.0  ;;  %v756_v7 = vmul.f32 %v748_v48, %v737_v3 }
 0x2e2   : > { %786 = vst [vmem:[%s379_s20 + $0x18] sm:$0xff] %v782_v6  ;;  %v772_v8 = vadd.f32 %v764_v51, %v756_v7 }
 0x2e4   : > { %v776_v1 = vadd.f32 %v772_v8, %v1227_v4 }
 0x2e6   : > { %v780_v9 = vmax.f32 %v776_v1, 0.0 }
 0x2e8   : > { %784 = vst [vmem:[%s379_s20 + $0x8] sm:$0xff] %v780_v9 }
 0x2e9   : > { %1019 = shalt.err (!%p1016_p4)
}
 0x2ea   : > { %s1067_s18 = smov 256  }
 0x2eb   : > { %907 = dma.vmem_to_hbm [thread:$0]  (%p1173_p11), %s801_s11, 512, %s803_s27, %s788_s17, %s1067_s18, %s1067_s18, %s1064_s30  }
 0x2ec PF: > { %s817_s29 = sand.u32 1, %s1046_s13   ;;  %p1444_p7 = scmp.ge.s32.totalorder %s1058_s16, 2 }
 0x2ed   : > { %s818_s23 = scalar_lea.sflag [#allocation5], %s817_s29 }
 0x2ee   : > { %p914_p5 = pnand %p1444_p7, %p1177_p12 }
 0x2f0   : > { %p915_p8 = pneg %p914_p5 }
 0x2f2   : > { %1041 = dma.done.wait (%p915_p8), %s818_s23, 512  }
 0x2f3   : > { %1043 = vsyncadd (%p915_p8), %s818_s23, 4294966784  ;;  %s1445_s16 = sld [smem:[#allocation10_spill]]  ;;  %s1448_s13 = smov %s1050_s14 }
 0x2f4   : > { %s1446_s19 = sld [smem:[#allocation9_spill]] }
 0x2f5   : > { %s1447_s15 = sld [smem:[#allocation11_spill]] }
 0x2f9   : > { %p23_p10 = scmp.ge.s32.totalorder %s1445_s16, 4  }
 0x2fa   : > { %s1449_s14 = smov %s1446_s19 }
 0x2fb   :  { %25 = sbr.rel (!%p23_p10) target bundleno = 5 (0x5), region = 105 }
 0x300   :  { %824 = vsyncpa [#allocation4], 1 }
 0x301   :  { %826 = vsyncpa [#allocation4 + $0x1], 1 }
 0x302   :  { %827 = vsyncpa [#allocation5], 1 }
 0x303   :  { %829 = vsyncpa [#allocation5 + $0x1], 1 }

</bundles_post_ra>
